<compile_context>
chip_gen: v6e
topology: v6e:2x2x1
jax: 0.10.0
libtpu: 0.0.40
codegen_flags: <defaults>
</compile_context>

<pallas_src>
import math

import jax
import jax.numpy as jnp
from jax.experimental import pallas as pl
from jax.experimental.pallas import tpu as pltpu


# --------------------------------------------------------------------------
# helpers
# --------------------------------------------------------------------------
def _cdiv(a, b):
    return -(-a // b)


def _round_up(x, m):
    return _cdiv(x, m) * m


def _sublane(dtype):
    # second-minor tiling multiple per dtype (f32: 8, bf16: 16, int8/fp8: 32)
    return {4: 8, 2: 16, 1: 32}.get(jnp.dtype(dtype).itemsize, 8)


def _vmem_budget_bytes():
    """Generation-aware VMEM budget (leave headroom for compiler scratch)."""
    cap = 64 << 20
    try:
        info = pltpu.get_tpu_info()
        cap = int(getattr(info, "vmem_capacity_bytes", cap))
    except Exception:
        pass
    if cap >= (96 << 20):                    # v5e / v6e class: 128 MiB physical
        return 100 << 20
    return max(cap - (16 << 20), 32 << 20)   # v7x class: 64 MiB -> ~48 MiB


# --------------------------------------------------------------------------
# kernels — weight is pre-transposed to [K, N], so all contractions are the
# standard (tm, tk) @ (tk, tn) form (no per-tile transpose).
# --------------------------------------------------------------------------
def _k1_kernel(x_ref, w_ref, o_ref):
    o_ref[...] = jnp.dot(
        x_ref[...], w_ref[...], preferred_element_type=jnp.float32
    ).astype(o_ref.dtype)


def _k1_bias_kernel(x_ref, w_ref, b_ref, o_ref):
    acc = jnp.dot(x_ref[...], w_ref[...], preferred_element_type=jnp.float32)
    o_ref[...] = (acc + b_ref[...].astype(jnp.float32)).astype(o_ref.dtype)


# ---- tiled-K path, float32 output: accumulate directly into o_ref ----------
def _k3_f32_kernel(x_ref, w_ref, o_ref):
    @pl.when(pl.program_id(2) == 0)
    def _():
        o_ref[...] = jnp.zeros_like(o_ref)

    o_ref[...] += jnp.dot(x_ref[...], w_ref[...], preferred_element_type=jnp.float32)


def _k3_f32_bias_kernel(x_ref, w_ref, b_ref, o_ref):
    @pl.when(pl.program_id(2) == 0)
    def _():
        o_ref[...] = jnp.broadcast_to(
            b_ref[...].astype(jnp.float32), o_ref.shape
        ).astype(o_ref.dtype)

    o_ref[...] += jnp.dot(x_ref[...], w_ref[...], preferred_element_type=jnp.float32)


# ---- tiled-K path, narrow output dtype: f32 scratch accumulator -------------
def _k3_kernel(x_ref, w_ref, o_ref, acc_ref):
    k = pl.program_id(2)

    @pl.when(k == 0)
    def _():
        acc_ref[...] = jnp.zeros_like(acc_ref)

    acc_ref[...] += jnp.dot(x_ref[...], w_ref[...], preferred_element_type=jnp.float32)

    @pl.when(k == pl.num_programs(2) - 1)
    def _():
        o_ref[...] = acc_ref[...].astype(o_ref.dtype)


def _k3_bias_kernel(x_ref, w_ref, b_ref, o_ref, acc_ref):
    k = pl.program_id(2)

    @pl.when(k == 0)
    def _():
        acc_ref[...] = jnp.zeros_like(acc_ref)

    acc_ref[...] += jnp.dot(x_ref[...], w_ref[...], preferred_element_type=jnp.float32)

    @pl.when(k == pl.num_programs(2) - 1)
    def _():
        o_ref[...] = (acc_ref[...] + b_ref[...].astype(jnp.float32)).astype(o_ref.dtype)


# --------------------------------------------------------------------------
# module
# --------------------------------------------------------------------------
class PallasQuantLinear:
    """Non-quantized forward path of QuantLinear: y = x @ W^T + b.

    Parameter layout prep (transpose to [K, N], pad N / tiled-K padding) is
    done ONCE at construction; the per-call path only pads the M axis of the
    activation when it is actually ragged.
    """

    def __init__(self, weight, bias=None, *, max_tm=512, max_tn=512):
        weight = jnp.asarray(weight)
        N, K = weight.shape
        self.N, self.K = int(N), int(K)
        self.max_tm = int(max_tm)
        self.max_tn = int(max_tn)
        itemsize = jnp.dtype(weight.dtype).itemsize

        # ---- one-time K-tiling decision -----------------------------------
        # Whole-K single tile whenever it fits comfortably: no K grid axis, no
        # accumulator, no K padding at all.
        single_k_limit = 4096 if itemsize >= 4 else 8192
        if K <= single_k_limit:
            self.single_k = True
            self.tk = K
            self.k_pad = K
            self.grid_k = 1
        else:
            self.single_k = False
            max_tk = 2048 if itemsize >= 4 else 4096
            k128 = _round_up(K, 128)
            grid_k = _cdiv(k128, max_tk)
            tk = _round_up(_cdiv(k128, grid_k), 128)   # minimal K over-pad
            self.tk = tk
            self.grid_k = grid_k
            self.k_pad = grid_k * tk

        # ---- one-time N tiling / padding ----------------------------------
        n128 = _round_up(N, 128)
        grid_n0 = _cdiv(n128, self.max_tn)
        self.tn0 = _round_up(_cdiv(n128, grid_n0), 128)
        self.n_pad = grid_n0 * self.tn0            # lane-dense output width

        # ---- one-time weight layout change: [N, K] -> [K_pad, N_pad] -------
        w_kn = weight.T
        if (self.k_pad, self.n_pad) != (K, N):
            w_kn = jnp.pad(w_kn, ((0, self.k_pad - K), (0, self.n_pad - N)))
        self.w_kn = w_kn

        if bias is not None:
            b = jnp.asarray(bias)
            if self.n_pad != N:
                b = jnp.pad(b, (0, self.n_pad - N))
            self.bias = b.reshape(1, self.n_pad)
        else:
            self.bias = None

    # ----------------------------------------------------------------------
    def __call__(self, x):
        *lead, K = x.shape
        assert K == self.K, "in_features mismatch"
        M = int(math.prod(lead)) if lead else 1
        dtype = x.dtype
        itemsize = jnp.dtype(dtype).itemsize
        sub = _sublane(dtype)
        is_f32_out = jnp.dtype(dtype) == jnp.dtype(jnp.float32)

        n_pad, k_pad, tk = self.n_pad, self.k_pad, self.tk
        has_bias = self.bias is not None

        # ---- tile selection -------------------------------------------------
        m_sub = _round_up(M, sub)
        # Cover all of M when it fits -> the weight streams from HBM exactly once.
        tm = m_sub if m_sub <= 2 * self.max_tm else self.max_tm
        tn = self.tn0

        budget = _vmem_budget_bytes()

        def vmem_need(tm_, tn_):
            n = 2 * (tm_ * tk + tk * tn_ + tm_ * tn_) * itemsize
            if has_bias:
                n += 2 * tn_ * itemsize
            if (not self.single_k) and (not is_f32_out):
                n += tm_ * tn_ * 4               # f32 accumulator scratch
            return n

        # Shrink tiles (keeping exact divisibility of the padded dims) until
        # double-buffered working set fits the generation-aware VMEM budget.
        while vmem_need(tm, tn) > budget and (tn % 256 == 0 or tm > sub):
            if tn >= tm and tn % 256 == 0:
                tn //= 2
            elif tm > sub:
                tm = max(sub, _round_up(tm // 2, sub))
            else:
                break

        m_pad = _round_up(M, tm)
        grid_m = m_pad // tm
        grid_n = n_pad // tn

        # ---- megacore occupancy: make sure the parallel grid has >= 2 tiles --
        if grid_m * grid_n == 1:
            if n_pad % 256 == 0:
                tn = n_pad // 2
                grid_n = 2
            elif m_pad % (2 * sub) == 0 and m_pad >= 2 * sub:
                tm = m_pad // 2
                grid_m = 2

        # ---- per-call operand prep: pad only when actually ragged ------------
        x2d = x.reshape(M, K)
        if m_pad != M or k_pad != K:
            x2d = jnp.pad(x2d, ((0, m_pad - M), (0, k_pad - K)))

        operands = [x2d, self.w_kn] + ([self.bias] if has_bias else [])

        # ---- grid / specs ----------------------------------------------------
        if self.single_k:
            grid = (grid_m, grid_n)
            x_spec = pl.BlockSpec((tm, tk), lambda i, j: (i, 0))
            w_spec = pl.BlockSpec((tk, tn), lambda i, j: (0, j))
            b_spec = pl.BlockSpec((1, tn), lambda i, j: (0, j))
            o_spec = pl.BlockSpec((tm, tn), lambda i, j: (i, j))
            scratch = []
            kernel = _k1_bias_kernel if has_bias else _k1_kernel
            semantics = ("parallel", "parallel")
        else:
            grid = (grid_m, grid_n, self.grid_k)
            x_spec = pl.BlockSpec((tm, tk), lambda i, j, k: (i, k))
            w_spec = pl.BlockSpec((tk, tn), lambda i, j, k: (k, j))
            b_spec = pl.BlockSpec((1, tn), lambda i, j, k: (0, j))
            o_spec = pl.BlockSpec((tm, tn), lambda i, j, k: (i, j))
            if is_f32_out:
                # accumulate straight into the resident f32 output tile
                scratch = []
                kernel = _k3_f32_bias_kernel if has_bias else _k3_f32_kernel
            else:
                scratch = [pltpu.VMEM((tm, tn), jnp.float32)]
                kernel = _k3_bias_kernel if has_bias else _k3_kernel
            semantics = ("parallel", "parallel", "arbitrary")

        in_specs = [x_spec, w_spec] + ([b_spec] if has_bias else [])

        need = vmem_need(tm, tn)
        vmem_limit = min(max(2 * need, 32 << 20), budget)

        cost = pl.CostEstimate(
            flops=2 * m_pad * n_pad * k_pad,
            transcendentals=0,
            bytes_accessed=(m_pad * k_pad + k_pad * n_pad + m_pad * n_pad) * itemsize,
        )

        out2d = pl.pallas_call(
            kernel,
            out_shape=jax.ShapeDtypeStruct((m_pad, n_pad), dtype),
            grid_spec=pltpu.PrefetchScalarGridSpec(
                num_scalar_prefetch=0,
                grid=grid,
                in_specs=in_specs,
                out_specs=o_spec,
                scratch_shapes=scratch,
            ),
            compiler_params=pltpu.CompilerParams(
                dimension_semantics=semantics,
                vmem_limit_bytes=vmem_limit,
            ),
            cost_estimate=cost,
        )(*operands)

        if m_pad != M or n_pad != self.N:
            out2d = out2d[:M, : self.N]
        return out2d.reshape(*lead, self.N)


# TODO(synk): UniformAffineQuantizer (use_weight_quant / use_act_quant
# branches) is not defined in the provided module, so only the default
# F.linear path of QuantLinear.forward is implemented here.


# --------------------------------------------------------------------------
# self-test
# --------------------------------------------------------------------------
if __name__ == "__main__":
    HI = jax.lax.Precision.HIGHEST
    key = jax.random.PRNGKey(0)
    k_x, k_w, k_b, k_x2, k_w2, k_x3, k_w3 = jax.random.split(key, 7)

    # Case 1: bias + tiny K -> single-shot K path (2-D grid, no scratch).
    batch, seq, in_features, out_features = 2, 8, 32, 64
    x = jax.random.normal(k_x, (batch, seq, in_features), dtype=jnp.float32)
    w = jax.random.normal(k_w, (out_features, in_features), dtype=jnp.float32) * 0.05
    b = jax.random.normal(k_b, (out_features,), dtype=jnp.float32) * 0.1

    layer = PallasQuantLinear(w, b)                 # one-time weight layout prep
    out = jax.block_until_ready(layer(x))
    ref = jnp.einsum("bsk,nk->bsn", x, w, precision=HI) + b
    assert out.shape == (batch, seq, out_features)
    assert jnp.allclose(out, ref, atol=1e-4, rtol=1e-4)

    # Case 2: no bias + mid-size K (2304) stays on the single-shot whole-K path
    # (no K padding, no accumulator scratch, no per-call weight copies).
    in2, out2_feats = 2304, 192
    x2 = jax.random.normal(k_x2, (2, 4, in2), dtype=jnp.float32)
    w2 = jax.random.normal(k_w2, (out2_feats, in2), dtype=jnp.float32) * 0.02
    layer2 = PallasQuantLinear(w2, None)
    out2 = jax.block_until_ready(layer2(x2))
    ref2 = jnp.einsum("bsk,nk->bsn", x2, w2, precision=HI)
    assert out2.shape == (2, 4, out2_feats)
    assert jnp.allclose(out2, ref2, atol=5e-3, rtol=5e-3)

    # Case 3: large K (4224 > 4096) -> tiled-K 3-D grid with direct f32
    # accumulation into the resident output tile (no scratch).
    in3, out3_feats = 4224, 256
    x3 = jax.random.normal(k_x3, (2, 4, in3), dtype=jnp.float32) * 0.1
    w3 = jax.random.normal(k_w3, (out3_feats, in3), dtype=jnp.float32) * 0.02
    layer3 = PallasQuantLinear(w3, None)
    out3 = jax.block_until_ready(layer3(x3))
    ref3 = jnp.einsum("bsk,nk->bsn", x3, w3, precision=HI)
    assert out3.shape == (2, 4, out3_feats)
    assert jnp.allclose(out3, ref3, atol=5e-3, rtol=5e-3)

    print("KERNEL_OK")
</pallas_src>

<mosaic_0001>
module attributes {stable_mosaic.version = 11 : i64} {
  func.func @_k1_bias_kernel(%arg0: i32, %arg1: i32, %arg2: memref<8x32xf32, #tpu.memory_space<vmem>>, %arg3: memref<32x128xf32, #tpu.memory_space<vmem>>, %arg4: memref<1x128xf32, #tpu.memory_space<vmem>>, %arg5: memref<8x128xf32, #tpu.memory_space<vmem>>) attributes {dimension_semantics = [#tpu.dimension_semantics<parallel>, #tpu.dimension_semantics<parallel>], iteration_bounds = array<i64: 2, 1>, scalar_prefetch = 0 : i64, scratch_operands = 0 : i64, tpu.core_type = #tpu.core_type<tc>, window_params = [{transform_indices = @transform_0, window_bounds = array<i64: 8, 32>}, {transform_indices = @transform_1, window_bounds = array<i64: 32, 128>}, {transform_indices = @transform_2, window_bounds = array<i64: 1, 128>}, {transform_indices = @transform_3, window_bounds = array<i64: 8, 128>}]} {
    %c0 = arith.constant 0 : index
    %c0_0 = arith.constant 0 : index
    %0 = vector.load %arg2[%c0, %c0_0] : memref<8x32xf32, #tpu.memory_space<vmem>>, vector<8x32xf32>
    %c0_1 = arith.constant 0 : index
    %c0_2 = arith.constant 0 : index
    %1 = vector.load %arg3[%c0_1, %c0_2] : memref<32x128xf32, #tpu.memory_space<vmem>>, vector<32x128xf32>
    %cst = arith.constant dense<0.000000e+00> : vector<8x128xf32>
    %2 = tpu.matmul %0, %1, %cst {dimension_numbers = #tpu.dot_dimension_numbers<[1], [0], [0], [1], [0, 0, 1, 1], [], []>} : vector<8x32xf32>, vector<32x128xf32>, vector<8x128xf32> -> vector<8x128xf32>
    %c0_3 = arith.constant 0 : index
    %c0_4 = arith.constant 0 : index
    %3 = vector.load %arg4[%c0_3, %c0_4] : memref<1x128xf32, #tpu.memory_space<vmem>>, vector<1x128xf32>
    %4 = vector.broadcast %3 : vector<1x128xf32> to vector<8x128xf32>
    %5 = arith.addf %2, %4 : vector<8x128xf32>
    %c0_5 = arith.constant 0 : index
    %c0_6 = arith.constant 0 : index
    %6 = vector.load %arg5[%c0_5, %c0_6] : memref<8x128xf32, #tpu.memory_space<vmem>>, vector<8x128xf32>
    tpu.vector_store %arg5[%c0_5, %c0_6], %5 {strides = array<i32>} : memref<8x128xf32, #tpu.memory_space<vmem>>, vector<8x128xf32>,
    return
  }
  func.func @transform_0(%arg0: i32, %arg1: i32) -> (i32, i32) {
    %c0_i32 = arith.constant 0 : i32
    %c0_i32_0 = arith.constant 0 : i32
    return %arg0, %c0_i32 : i32, i32
  }
  func.func @transform_1(%arg0: i32, %arg1: i32) -> (i32, i32) {
    %c0_i32 = arith.constant 0 : i32
    %c0_i32_0 = arith.constant 0 : i32
    return %c0_i32, %arg1 : i32, i32
  }
  func.func @transform_2(%arg0: i32, %arg1: i32) -> (i32, i32) {
    %c0_i32 = arith.constant 0 : i32
    %c0_i32_0 = arith.constant 0 : i32
    return %c0_i32, %arg1 : i32, i32
  }
  func.func @transform_3(%arg0: i32, %arg1: i32) -> (i32, i32) {
    %c0_i32 = arith.constant 0 : i32
    return %arg0, %arg1 : i32, i32
  }
}

</mosaic_0001>

<bundles_post_ra>
// kernel: tpu_custom_call.1
= control target key start
LH: loop header
LB: loop body
LE: loop exit
PB: predicated region body
PF: predicated region fallthrough
CT: control target
= control target key end

     0   :  { %8 = vsyncpa [#allocation3], 0  ;;  %s895_s0 = inlined_call_operand.hbm [shape: f32[16,32], index: 0, kind: input, shape index: {}]   ;;  %s896_s1 = inlined_call_operand.hbm [shape: f32[32,128], index: 1, kind: input, shape index: {}]   ;;  %s897_s2 = inlined_call_operand.vmem [shape: f32[1,128], index: 2, kind: input, shape index: {}]   ;;  %s898_s3 = inlined_call_operand.hbm [shape: f32[16,128], index: 3, kind: output, shape index: {}]  }
   0x1   :  { %10 = vsyncpa [#allocation3 + $0x1], 0 }
   0x2   :  { %11 = vsyncpa [#allocation6], 0 }
   0x3   :  { %12 = vsyncpa [#allocation4], 0 }
   0x4   :  { %14 = vsyncpa [#allocation4 + $0x1], 0  ;;  %s719_s12 = smov 0   ;;  %s721_s13 = smov 0  }
   0x5   :  { %s723_s14 = smov 0   ;;  %s725_s15 = smov 0  }
   0x6   :  { %s727_s16 = smov 0   ;;  %s729_s17 = smov 0  }
   0x7 LB: > { %s441_s18 = sadd.s32 4294967295, %s690_s17   ;;  %s442_s19 = sadd.s32 4294967294, %s690_s17   ;;  %s690_s17 = sphi %s729_s17, %s20_s17   ;;  %s686_s16 = sphi %s727_s16, %s916_s16   ;;  %s682_s15 = sphi %s725_s15, %s915_s15   ;;  %s678_s14 = sphi %s723_s14, %s914_s14   ;;  %s674_s13 = sphi %s721_s13, %s913_s13   ;;  %s670_s12 = sphi %s719_s12, %s912_s12  }
   0x8   : > { %p52_p0 = scmp.ne.s32.totalorder %s674_s13, %s670_s12  ;;  %p753_p1 = scmp.eq.s32.totalorder %s441_s18, 0 }
   0x9   : > { %p757_p2 = scmp.eq.s32.totalorder %s441_s18, 1  ;;  %p136_p3 = scmp.eq.s32.totalorder %s442_s19, 1 }
   0xa   : > { %p763_p4 = por %p753_p1, %p52_p0  ;;  %p443_p5 = scmp.ge.s32.totalorder %s690_s17, 1 }
   0xb   : > { %p768_p6 = por %p136_p3, %p52_p0  ;;  %p143_p7 = scmp.lt.s32.totalorder %s690_s17, 3 }
   0xc   : > { %s902_s22 = scalar_select %p763_p4, 1, 0 }
   0xd   : > { %s903_s23 = scalar_select %p768_p6, 1, 0 }
   0xe   : > { %p773_p8 = pnand %p443_p5, %p143_p7  ;;  %s692_s25 = smov [#allocation5]  }
   0xf   : > { %s157_s26 = sshll.u32 %s692_s25, 4  ;;  %s32_s28 = sadd.s32 1, %s686_s16  ;;  %s158_s26 = int_to_ptr.vmem [resolvable:$true] %s157_s26 }
  0x10   : > { %p483_p9 = pneg %p773_p8  ;;  %s563_s29 = scalar_lea.vmem %s158_s26, 512 }
  0x11   : > { %p564_p13 = scmp.ne.s32.totalorder %s158_s26, %s563_s29  ;;  %p571_p5 = scmp.lt.s32.totalorder %s158_s26, %s158_s26 }
  0x12   : > { %p782_p11 = pnand %p483_p9, %p753_p1  ;;  %p572_p7 = scmp.lt.s32.totalorder %s563_s29, %s563_s29 }
  0x14   : > { %p554_p12 = pneg %p782_p11  ;;  %p573_p6 = por %p572_p7, %p571_p5 }
  0x16   : > { %p566_p0 = pnand %p564_p13, %p554_p12 }
  0x18   : > { %p567_p3 = pneg %p566_p0 }
  0x1a   : > { %p574_p4 = pnand %p573_p6, %p567_p3 }
  0x1c   : > { %577 = shalt.err (!%p574_p4)
}
  0x1d   : > { %s693_s30 = smov 128   ;;  %s694_s4 = smov 8  }
  0x1e   : > { %486 = dma.hbm_to_vmem [thread:$0]  (!%p782_p11), %s896_s1, 512, %s158_s26, [#allocation6], %s693_s30, %s693_s30, %s694_s4  }
  0x1f   : > { %p34_p6 = scmp.ge.s32.totalorder %s32_s28, 2  ;;  %s39_s7 = sadd.s32 1, %s678_s14 }
  0x20   : > { %p46_p4 = scmp.ne.s32.totalorder %s678_s14, %s674_s13  ;;  %p47_p9 = scmp.eq.s32.totalorder %s690_s17, 0 }
  0x21   : > { %s918_s28 = smov (%p34_p6, %s32_s28), 0  ;;  %p496_p0 = scmp.lt.s32.totalorder %s690_s17, 2 }
  0x22   : > { %p800_p12 = por %p47_p9, %p46_p4  ;;  %p806_p13 = por %p757_p2, %p46_p4 }
  0x23   : > { %s36_s10 = ssub.s32 %s686_s16, %s918_s28  ;;  %s177_s11 = sand.u32 1, %s678_s14  }
  0x24   : > { %p37_p11 = scmp.eq.s32.totalorder %s36_s10, 0  ;;  %s447_s18 = sshll.u32 %s177_s11, 3 }
  0x25   : > { %s448_s25 = sshll.u32 %s686_s16, 7  ;;  %s181_s30 = scalar_lea.vmem [#allocation2], %s447_s18 }
  0x26   : > { %s815_s19 = scalar_select %p37_p11, %s678_s14, %s39_s7  }
  0x27   : > { %s186_s29 = scalar_lea.hbm %s895_s0, %s448_s25  ;;  %s188_s4 = sshll.u32 %s181_s30, 4  ;;  %s189_s4 = int_to_ptr.vmem [resolvable:$true] %s188_s4 }
  0x28   : > { %p823_p2 = pnand %p496_p0, %p800_p12  ;;  %s178_s5 = scalar_lea.sflag [#allocation3], %s177_s11 }
  0x29   : > { %s591_s6 = scalar_lea.vmem %s189_s4, 128  ;;  %s695_s7 = smov [#allocation2]  }
  0x2a   : > { %p580_p3 = pneg %p823_p2  ;;  %p592_p5 = scmp.ne.s32.totalorder %s189_s4, %s591_s6 }
  0x2b   : > { %s596_s10 = sshll.u32 %s695_s7, 4  ;;  %s597_s10 = int_to_ptr.vmem [resolvable:$false] %s596_s10 }
  0x2c   : > { %p594_p7 = pnand %p592_p5, %p580_p3  ;;  %s598_s25 = scalar_lea.vmem %s597_s10, 256 }
  0x2d   : > { %p599_p4 = scmp.lt.s32.totalorder %s189_s4, %s597_s10  ;;  %p600_p9 = scmp.lt.s32.totalorder %s598_s25, %s591_s6 }
  0x2e   : > { %p595_p6 = pneg %p594_p7 }
  0x2f   : > { %p601_p11 = por %p600_p9, %p599_p4 }
  0x31   : > { %p602_p10 = pnand %p601_p11, %p595_p6 }
  0x33   : > { %605 = shalt.err (!%p602_p10)
}
  0x34   : > { %490 = dma.hbm_to_vmem [thread:$0]  (!%p823_p2), %s186_s29, 128, %s189_s4, %s178_s5  }
  0x35   : > { %197 = sbr.rel (%p773_p8) target bundleno = 278 (0x116), region = 32  ;;  %s834_s8 = sand.u32 (!%p773_p8), 1, %s674_s13  }
  0x36   : > { %s450_s11 = sshll.u32 (!%p773_p8), %s834_s8, 3  ;;  %s200_s18 = scalar_lea.sflag (!%p773_p8), [#allocation3], %s834_s8 }
  0x37   : > { %s203_s26 = scalar_lea.vmem (!%p773_p8), [#allocation2], %s450_s11  ;;  %p909_p12 = scmp.ne.s32.totalorder (!%p773_p8), %s902_s22, 0 }
  0x3a   : > { %657 = dma.done.wait (%p909_p12), %s200_s18, 128  }
  0x3b   : > { %659 = vsyncadd (%p909_p12), %s200_s18, 4294967168 }
  0x3c   : > { %661 = dma.done.wait (%p753_p1), [#allocation6], 512  }
  0x3d   : > { %663 = vsyncadd (%p753_p1), [#allocation6], 4294966784  ;;  %v696_v0 = vmov 0.0   ;;  %vm697_vm0 = vmmov 0   ;;  %v240_v1 = vld [vmem:[#allocation5 + $0x18] sm:$0xff]  ;;  %v239_v2 = vld [vmem:[#allocation5 + $0x10] sm:$0xff] }
  0x3e   : > { %464 = vmatprep.subr.mxu0 %v696_v0  ;;  %472 = vmatprep.mubr.msk.f32.mxu0 %vm697_vm0, %v696_v0  ;;  %v238_v3 = vld [vmem:[#allocation5 + $0x8] sm:$0xff]  ;;  %v237_v4 = vld [vmem:[#allocation5] sm:$0xff]  ;;  %v236_v5 = vld [vmem:[%s203_s26] sm:$0xff]  ;;  %vm248_vm1 = vcmask 261120   ;;  %s456_s24 = sshll.u32 %s682_s15, 7  ;;  %s232_s27 = scalar_lea.vmem [#allocation7], %s450_s11 }
  0x3f   : > { %465 = vmatpush3.msra.mxu0 %v240_v1  ;;  %v453_v6 = vld [vmem:[%s897_s2] ss:$0 sm:$0xff]  ;;  %s338_s29 = sshll.u32 %s232_s27, 4  ;;  %s853_s21 = scalar_lea.hbm %s898_s3, %s456_s24  ;;  %s339_s29 = int_to_ptr.vmem [resolvable:$true] %s338_s29 }
  0x40   : > { %466 = vmatprep.subr.mxu0 %v696_v0  ;;  %s324_s5 = scalar_lea.sflag [#allocation4], %s834_s8  ;;  %s606_s6 = scalar_lea.vmem %s339_s29, 128 }
  0x41   : > { %467 = vmatpush3.msra.mxu0 %v239_v2  ;;  %p607_p1 = scmp.ne.s32.totalorder %s339_s29, %s606_s6  ;;  %s698_s7 = smov [#allocation7]  }
  0x42   : > { %468 = vmatprep.subr.mxu0 %v696_v0  ;;  %s610_s15 = sshll.u32 %s698_s7, 4  ;;  %s611_s15 = int_to_ptr.vmem [resolvable:$false] %s610_s15 }
  0x43   : > { %469 = vmatpush3.msra.mxu0 %v238_v3  ;;  %p608_p8 = pnand %p607_p1, %p806_p13  ;;  %s612_s10 = scalar_lea.vmem %s611_s15, 256 }
  0x44   : > { %470 = vmatprep.subr.mxu0 %v696_v0  ;;  %p613_p0 = scmp.lt.s32.totalorder %s339_s29, %s611_s15  ;;  %p614_p2 = scmp.lt.s32.totalorder %s612_s10, %s606_s6 }
  0x45   : > { %471 = vmatpush3.msra.mxu0 %v237_v4  ;;  %p609_p10 = pneg %p608_p8 }
  0x46   : > { %473 = vmatmul.mubr.msk.f32.vlgmr.msra.gmra.mxu0 %vm248_vm1, %v236_v5  ;;  %p615_p3 = por %p614_p2, %p613_p0 }
  0x48   : > { %p616_p5 = pnand %p615_p3, %p609_p10 }
 0x106   : > { %v318_v7 = vpop.f32.mrf.mxu0 }
 0x107   : > { %v319_v8 = vadd.f32 %v453_v6, %v318_v7 }
 0x108   : > { %v474_v9 = vpop.f32.mrf.mxu0 }
 0x109   : > { %322 = vst [vmem:[%s232_s27] sm:$0xff] %v319_v8 }
 0x10a   : > { %619 = shalt.err (!%p616_p5)
}
 0x10b   : > { %s620_s25 = scalar_lea.hbm %s853_s21, 128  ;;  %s624_s18 = scalar_lea.hbm %s898_s3, 256 }
 0x10c   : > { %p621_p7 = scmp.ne.s32.totalorder %s853_s21, %s620_s25  ;;  %p625_p9 = scmp.lt.s32.totalorder %s853_s21, %s898_s3 }
 0x10d   : > { %p626_p11 = scmp.lt.s32.totalorder %s624_s18, %s620_s25 }
 0x10e   : > { %p622_p6 = pnand %p621_p7, %p806_p13 }
 0x10f   : > { %p627_p12 = por %p626_p11, %p625_p9 }
 0x110   : > { %p623_p4 = pneg %p622_p6 }
 0x112   : > { %p628_p1 = pnand %p627_p12, %p623_p4 }
 0x114   : > { %631 = shalt.err (!%p628_p1)
}
 0x115   : > { %481 = dma.vmem_to_hbm [thread:$0]  (%p806_p13), %s339_s29, 128, %s853_s21, %s324_s5  }
 0x116 PF: > { %s350_s22 = sand.u32 1, %s670_s12   ;;  %p910_p8 = scmp.ne.s32.totalorder %s903_s23, 0 }
 0x117   : > { %p911_p10 = scmp.ge.s32.totalorder %s690_s17, 2  ;;  %s351_s24 = scalar_lea.sflag [#allocation4], %s350_s22 }
 0x119   : > { %p492_p0 = pnand %p911_p10, %p910_p8 }
 0x11b   : > { %p493_p2 = pneg %p492_p0 }
 0x11d   : > { %665 = dma.done.wait (%p493_p2), %s351_s24, 128  }
 0x11e   : > { %667 = vsyncadd (%p493_p2), %s351_s24, 4294967168  ;;  %s20_s17 = sadd.s32 1, %s690_s17   ;;  %s912_s12 = smov %s674_s13 }
 0x11f   : > { %p17_p3 = scmp.ge.s32.totalorder %s20_s17, 4   ;;  %s913_s13 = smov %s678_s14 }
 0x120   : > { %s914_s14 = smov %s815_s19  ;;  %s915_s15 = smov %s686_s16 }
 0x121   : > { %s916_s16 = smov %s918_s28  ;;  %19 = sbr.rel (!%p17_p3) target bundleno = 7 (0x7), region = 85 }
 0x126   :  { %356 = vsyncpa [#allocation3], 1 }
 0x127   :  { %358 = vsyncpa [#allocation3 + $0x1], 1 }
 0x128   :  { %359 = vsyncpa [#allocation6], 1 }
 0x129   :  { %360 = vsyncpa [#allocation4], 1 }
 0x12a   :  { %362 = vsyncpa [#allocation4 + $0x1], 1 }

</bundles_post_ra>
